<compile_context>
chip_gen: v6e
topology: v6e:2x2x1
jax: 0.10.0
libtpu: 0.0.40
codegen_flags: <defaults>
</compile_context>

<pallas_src>
import functools

import jax
import jax.numpy as jnp
from jax import lax
from jax.experimental import pallas as pl
from jax.experimental.pallas import tpu as pltpu


# ------------------------------ phase 1 kernel -------------------------------

def _gram_softmax_kernel(x_ref, attn_ref, acc_ref, *, matmul_dtype):
    """Accumulate energy = x @ x^T over HW tiles, softmax(-energy) on last tile.

    x_ref: (1, C, hw_t) block, attn_ref: (1, C, C), acc_ref: (C, C) f32 scratch.
    """
    t = pl.program_id(1)

    @pl.when(t == 0)
    def _():
        acc_ref[...] = jnp.zeros_like(acc_ref)

    x = x_ref[0].astype(matmul_dtype)                       # (C, hw_t)
    # energy += x @ x^T: contract the HW (lane) dim of BOTH operands.  The
    # transposed-RHS contraction is fed straight to the MXU (no XLU transpose).
    acc_ref[...] += lax.dot_general(
        x, x, (((1,), (1,)), ((), ())),
        preferred_element_type=jnp.float32)

    @pl.when(t == pl.num_programs(1) - 1)
    def _():
        energy = acc_ref[...]                               # (C, C) f32
        # softmax(rowmax(energy) - energy) == softmax(-energy); the row-MIN
        # shift is the numerically identical stable form (all exponents <= 0).
        shift = jnp.min(energy, axis=-1, keepdims=True)
        p = jnp.exp(shift - energy)
        attn_ref[0] = p / jnp.sum(p, axis=-1, keepdims=True)  # exact divide


# ------------------------------ phase 2 kernel -------------------------------

def _apply_attn_kernel(gamma_ref, attn_ref, x_ref, o_ref, *, matmul_dtype):
    """o = gamma * (attn @ v_tile) + x_tile for one (batch, HW-tile) block."""
    x = x_ref[0]                                            # (C, hw_t) f32
    out = jnp.dot(attn_ref[0].astype(matmul_dtype),
                  x.astype(matmul_dtype),
                  preferred_element_type=jnp.float32)       # (C, hw_t) f32
    o_ref[0] = gamma_ref[0] * out + x                       # lane-dense store


# --------------------------------- policies ----------------------------------

def _pick_hw_tile(HW, C, *, vmem_budget=24 * 1024 * 1024, min_tiles=2):
    """Largest HW tile (multiple of 128, dividing HW) whose real VMEM footprint
    (2x in-block + 2x out-block + attention block + (C,C) f32 scratch) fits
    `vmem_budget`, preferring a tile that leaves >= min_tiles grid steps so the
    pipeline is double-buffered and v7x's second TensorCore gets work."""
    cands = [t for t in range(128, HW + 1, 128) if HW % t == 0]
    if not cands:
        return HW                       # no 128-multiple divisor: full-extent block
    fixed = 3 * C * C * 4               # attn block(s) + f32 energy scratch
    def footprint(t):
        return fixed + 4 * C * t * 4    # 2x input block + 2x output block (f32)
    fit = [t for t in cands if footprint(t) <= vmem_budget] or [cands[0]]
    pref = [t for t in fit if HW // t >= min_tiles]
    return max(pref) if pref else max(fit)


def _vmem_limit_bytes():
    """Per-generation scoped-VMEM limit: ~3/4 of physical, capped at 64 MiB
    (128 MiB parts: v5e/v6e -> 64 MiB; 64 MiB parts: v7x -> 48 MiB)."""
    try:
        phys = pltpu.get_tpu_info().vmem_capacity_bytes
        return min(64 * 1024 * 1024, int(phys) * 3 // 4)
    except Exception:
        return 32 * 1024 * 1024         # safe on every generation


# ---------------------------------- wrapper -----------------------------------

@functools.partial(jax.jit, static_argnames=("matmul_dtype",))
def channel_attention(x, gamma, *, matmul_dtype=jnp.float32):
    """ChannelAttentionModule.forward.  x: (N, C, H, W) f32, gamma: (1,) f32."""
    N, C, H, W = x.shape
    HW = H * W
    xf = x.reshape(N, C, HW).astype(jnp.float32)
    gamma = gamma.astype(jnp.float32)

    hw_t = _pick_hw_tile(HW, C)
    T = HW // hw_t
    vmem_limit = _vmem_limit_bytes()

    # Phase 1: attention = softmax(-x @ x^T) per image, HW tiled as a reduction.
    attn = pl.pallas_call(
        functools.partial(_gram_softmax_kernel, matmul_dtype=matmul_dtype),
        out_shape=jax.ShapeDtypeStruct((N, C, C), jnp.float32),
        grid=(N, T),
        in_specs=[pl.BlockSpec((1, C, hw_t), lambda b, t: (b, 0, t))],
        out_specs=pl.BlockSpec((1, C, C), lambda b, t: (b, 0, 0)),
        scratch_shapes=[pltpu.VMEM((C, C), jnp.float32)],
        compiler_params=pltpu.CompilerParams(
            dimension_semantics=("parallel", "arbitrary"),
            vmem_limit_bytes=vmem_limit),
    )(xf)

    # Phase 2: out = gamma * (attn @ v) + x, streamed over the same HW tiles.
    y = pl.pallas_call(
        functools.partial(_apply_attn_kernel, matmul_dtype=matmul_dtype),
        out_shape=jax.ShapeDtypeStruct((N, C, HW), jnp.float32),
        grid=(N, T),
        in_specs=[
            pl.BlockSpec(memory_space=pltpu.MemorySpace.SMEM),      # gamma (1,)
            pl.BlockSpec((1, C, C), lambda b, t: (b, 0, 0)),        # attention
            pl.BlockSpec((1, C, hw_t), lambda b, t: (b, 0, t)),     # x / value
        ],
        out_specs=pl.BlockSpec((1, C, hw_t), lambda b, t: (b, 0, t)),
        compiler_params=pltpu.CompilerParams(
            dimension_semantics=("parallel", "parallel"),
            vmem_limit_bytes=vmem_limit),
    )(gamma, attn, xf)

    return y.reshape(N, C, H, W)


# ----------------------------- pure-JAX reference -----------------------------

def cam_reference(x, gamma):
    N, C, H, W = x.shape
    q = x.reshape(N, C, H * W).astype(jnp.float32)
    energy = jnp.einsum("ncd,nkd->nck", q, q, precision=lax.Precision.HIGHEST)
    energy = jnp.max(energy, axis=-1, keepdims=True) - energy
    attn = jax.nn.softmax(energy, axis=-1)
    out = jnp.einsum("nck,nkd->ncd", attn, q,
                     precision=lax.Precision.HIGHEST).reshape(N, C, H, W)
    return gamma[0] * out + x


# ------------------------------------ main -------------------------------------

if __name__ == "__main__":
    key = jax.random.PRNGKey(0)
    N, C, H, W = 2, 64, 16, 16
    x = jax.random.normal(key, (N, C, H, W), jnp.float32)

    # gamma = zeros(1) matches nn.Parameter(torch.zeros(1)) at init -> out == x.
    gamma0 = jnp.zeros((1,), jnp.float32)
    y0 = jax.block_until_ready(channel_attention(x, gamma0))
    assert y0.shape == (N, C, H, W), y0.shape
    assert bool(jnp.allclose(y0, x, atol=1e-5)), "gamma=0 must return the input"

    gamma1 = jnp.full((1,), 0.5, jnp.float32)
    ref = cam_reference(x, gamma1)

    # Exact-parity path (f32 matmuls, exact softmax normalization).
    y1 = jax.block_until_ready(channel_attention(x, gamma1))
    assert bool(jnp.all(jnp.isfinite(y1)))
    assert bool(jnp.allclose(y1, ref, rtol=2e-3, atol=2e-3)), float(
        jnp.max(jnp.abs(y1 - ref)))

    # MXU-native bf16 matmul-operand path (f32 accumulate / softmax / residual).
    # Gram energies scale with HW, so bf16 operands carry ~1e-2-level energy
    # error into the exponent; validated at a correspondingly looser tolerance.
    y2 = jax.block_until_ready(
        channel_attention(x, gamma1, matmul_dtype=jnp.bfloat16))
    assert bool(jnp.all(jnp.isfinite(y2)))
    assert bool(jnp.allclose(y2, ref, rtol=1e-1, atol=1e-1)), float(
        jnp.max(jnp.abs(y2 - ref)))

    print("KERNEL_OK")
</pallas_src>

<mosaic_0001>
module attributes {stable_mosaic.version = 11 : i64} {
  func.func @_gram_softmax_kernel(%arg0: i32, %arg1: i32, %arg2: memref<1x64x128xf32, #tpu.memory_space<vmem>>, %arg3: memref<1x64x64xf32, #tpu.memory_space<vmem>>, %arg4: memref<64x64xf32, #tpu.memory_space<vmem>>) attributes {dimension_semantics = [#tpu.dimension_semantics<parallel>, #tpu.dimension_semantics<arbitrary>], iteration_bounds = array<i64: 2, 2>, scalar_prefetch = 0 : i64, scratch_operands = 1 : i64, tpu.core_type = #tpu.core_type<tc>, window_params = [{transform_indices = @transform_0, window_bounds = array<i64: 1, 64, 128>}, {transform_indices = @transform_1, window_bounds = array<i64: 1, 64, 64>}]} {
    %c0_i32 = arith.constant 0 : i32
    %0 = arith.cmpi eq, %arg1, %c0_i32 : i32
    %1 = arith.extui %0 : i1 to i32
    %c0_i32_0 = arith.constant 0 : i32
    %2 = arith.cmpi ne, %1, %c0_i32_0 : i32
    scf.if %2 {
      %cst_8 = arith.constant 0.000000e+00 : f32
      %12 = vector.broadcast %cst_8 : f32 to vector<64x64xf32>
      %c0_9 = arith.constant 0 : index
      %c0_10 = arith.constant 0 : index
      %13 = vector.load %arg4[%c0_9, %c0_10] : memref<64x64xf32, #tpu.memory_space<vmem>>, vector<64x64xf32>
      tpu.vector_store %arg4[%c0_9, %c0_10], %12 {strides = array<i32>} : memref<64x64xf32, #tpu.memory_space<vmem>>, vector<64x64xf32>,
    } else {
    }
    %c0 = arith.constant 0 : index
    %c0_1 = arith.constant 0 : index
    %c0_2 = arith.constant 0 : index
    %3 = vector.load %arg2[%c0, %c0_1, %c0_2] : memref<1x64x128xf32, #tpu.memory_space<vmem>>, vector<1x64x128xf32>
    %4 = vector.shape_cast %3 : vector<1x64x128xf32> to vector<64x128xf32>
    %c0_3 = arith.constant 0 : index
    %c0_4 = arith.constant 0 : index
    %5 = vector.load %arg4[%c0_3, %c0_4] : memref<64x64xf32, #tpu.memory_space<vmem>>, vector<64x64xf32>
    %cst = arith.constant dense<0.000000e+00> : vector<64x64xf32>
    %6 = tpu.matmul %4, %4, %cst {dimension_numbers = #tpu.dot_dimension_numbers<[1], [1], [0], [0], [0, 0, 1, 0], [], []>} : vector<64x128xf32>, vector<64x128xf32>, vector<64x64xf32> -> vector<64x64xf32>
    %7 = arith.addf %5, %6 : vector<64x64xf32>
    %c0_5 = arith.constant 0 : index
    %c0_6 = arith.constant 0 : index
    %8 = vector.load %arg4[%c0_5, %c0_6] : memref<64x64xf32, #tpu.memory_space<vmem>>, vector<64x64xf32>
    tpu.vector_store %arg4[%c0_5, %c0_6], %7 {strides = array<i32>} : memref<64x64xf32, #tpu.memory_space<vmem>>, vector<64x64xf32>,
    %c1_i32 = arith.constant 1 : i32
    %9 = arith.cmpi eq, %arg1, %c1_i32 : i32
    %10 = arith.extui %9 : i1 to i32
    %c0_i32_7 = arith.constant 0 : i32
    %11 = arith.cmpi ne, %10, %c0_i32_7 : i32
    scf.if %11 {
      %c0_8 = arith.constant 0 : index
      %c0_9 = arith.constant 0 : index
      %12 = vector.load %arg4[%c0_8, %c0_9] : memref<64x64xf32, #tpu.memory_space<vmem>>, vector<64x64xf32>
      %cst_10 = arith.constant dense<0x7F800000> : vector<64xf32>
      %13 = vector.multi_reduction <minimumf>, %12, %cst_10 [1] : vector<64x64xf32> to vector<64xf32>
      %14 = vector.shape_cast %13 : vector<64xf32> to vector<64x1xf32>
      %15 = vector.broadcast %14 : vector<64x1xf32> to vector<64x64xf32>
      %16 = arith.subf %15, %12 : vector<64x64xf32>
      %17 = math.exp %16 : vector<64x64xf32>
      %cst_11 = arith.constant dense<0.000000e+00> : vector<64xf32>
      %18 = vector.multi_reduction <add>, %17, %cst_11 [1] : vector<64x64xf32> to vector<64xf32>
      %19 = vector.shape_cast %18 : vector<64xf32> to vector<64x1xf32>
      %20 = vector.broadcast %19 : vector<64x1xf32> to vector<64x64xf32>
      %21 = arith.divf %17, %20 : vector<64x64xf32>
      %c0_12 = arith.constant 0 : index
      %c0_13 = arith.constant 0 : index
      %c0_14 = arith.constant 0 : index
      %22 = vector.load %arg3[%c0_12, %c0_13, %c0_14] : memref<1x64x64xf32, #tpu.memory_space<vmem>>, vector<1x64x64xf32>
      %23 = vector.shape_cast %22 : vector<1x64x64xf32> to vector<64x64xf32>
      %24 = vector.shape_cast %21 : vector<64x64xf32> to vector<1x64x64xf32>
      tpu.vector_store %arg3[%c0_12, %c0_13, %c0_14], %24 {strides = array<i32>} : memref<1x64x64xf32, #tpu.memory_space<vmem>>, vector<1x64x64xf32>,
    } else {
    }
    return
  }
  func.func @transform_0(%arg0: i32, %arg1: i32) -> (i32, i32, i32) {
    %c0_i32 = arith.constant 0 : i32
    %c0_i32_0 = arith.constant 0 : i32
    return %arg0, %c0_i32, %arg1 : i32, i32, i32
  }
  func.func @transform_1(%arg0: i32, %arg1: i32) -> (i32, i32, i32) {
    %c0_i32 = arith.constant 0 : i32
    %c0_i32_0 = arith.constant 0 : i32
    %c0_i32_1 = arith.constant 0 : i32
    return %arg0, %c0_i32, %c0_i32_0 : i32, i32, i32
  }
}

module attributes {stable_mosaic.version = 11 : i64} {
  func.func @_apply_attn_kernel(%arg0: i32, %arg1: i32, %arg2: memref<1xf32, #tpu.memory_space<smem>>, %arg3: memref<1x64x64xf32, #tpu.memory_space<vmem>>, %arg4: memref<1x64x128xf32, #tpu.memory_space<vmem>>, %arg5: memref<1x64x128xf32, #tpu.memory_space<vmem>>) attributes {dimension_semantics = [#tpu.dimension_semantics<parallel>, #tpu.dimension_semantics<parallel>], iteration_bounds = array<i64: 2, 2>, scalar_prefetch = 0 : i64, scratch_operands = 0 : i64, tpu.core_type = #tpu.core_type<tc>, window_params = [{transform_indices = @transform_0, window_bounds = array<i64: 1>}, {transform_indices = @transform_1, window_bounds = array<i64: 1, 64, 64>}, {transform_indices = @transform_2, window_bounds = array<i64: 1, 64, 128>}, {transform_indices = @transform_3, window_bounds = array<i64: 1, 64, 128>}]} {
    %c0 = arith.constant 0 : index
    %c0_0 = arith.constant 0 : index
    %c0_1 = arith.constant 0 : index
    %0 = vector.load %arg4[%c0, %c0_0, %c0_1] : memref<1x64x128xf32, #tpu.memory_space<vmem>>, vector<1x64x128xf32>
    %1 = vector.shape_cast %0 : vector<1x64x128xf32> to vector<64x128xf32>
    %c0_2 = arith.constant 0 : index
    %c0_3 = arith.constant 0 : index
    %c0_4 = arith.constant 0 : index
    %2 = vector.load %arg3[%c0_2, %c0_3, %c0_4] : memref<1x64x64xf32, #tpu.memory_space<vmem>>, vector<1x64x64xf32>
    %3 = vector.shape_cast %2 : vector<1x64x64xf32> to vector<64x64xf32>
    %cst = arith.constant dense<0.000000e+00> : vector<64x128xf32>
    %4 = tpu.matmul %3, %1, %cst {dimension_numbers = #tpu.dot_dimension_numbers<[1], [0], [0], [1], [0, 0, 1, 1], [], []>} : vector<64x64xf32>, vector<64x128xf32>, vector<64x128xf32> -> vector<64x128xf32>
    %c0_5 = arith.constant 0 : index
    %5 = memref.load %arg2[%c0_5] : memref<1xf32, #tpu.memory_space<smem>>
    %6 = vector.broadcast %5 : f32 to vector<64x128xf32>
    %7 = arith.mulf %6, %4 : vector<64x128xf32>
    %8 = arith.addf %7, %1 : vector<64x128xf32>
    %c0_6 = arith.constant 0 : index
    %c0_7 = arith.constant 0 : index
    %c0_8 = arith.constant 0 : index
    %9 = vector.load %arg5[%c0_6, %c0_7, %c0_8] : memref<1x64x128xf32, #tpu.memory_space<vmem>>, vector<1x64x128xf32>
    %10 = vector.shape_cast %9 : vector<1x64x128xf32> to vector<64x128xf32>
    %11 = vector.shape_cast %8 : vector<64x128xf32> to vector<1x64x128xf32>
    tpu.vector_store %arg5[%c0_6, %c0_7, %c0_8], %11 {strides = array<i32>} : memref<1x64x128xf32, #tpu.memory_space<vmem>>, vector<1x64x128xf32>,
    return
  }
  func.func @transform_0(%arg0: i32, %arg1: i32) -> i32 {
    %c0_i32 = arith.constant 0 : i32
    %c0_i32_0 = arith.constant 0 : i32
    return %c0_i32 : i32
  }
  func.func @transform_1(%arg0: i32, %arg1: i32) -> (i32, i32, i32) {
    %c0_i32 = arith.constant 0 : i32
    %c0_i32_0 = arith.constant 0 : i32
    %c0_i32_1 = arith.constant 0 : i32
    return %arg0, %c0_i32, %c0_i32_0 : i32, i32, i32
  }
  func.func @transform_2(%arg0: i32, %arg1: i32) -> (i32, i32, i32) {
    %c0_i32 = arith.constant 0 : i32
    %c0_i32_0 = arith.constant 0 : i32
    return %arg0, %c0_i32, %arg1 : i32, i32, i32
  }
  func.func @transform_3(%arg0: i32, %arg1: i32) -> (i32, i32, i32) {
    %c0_i32 = arith.constant 0 : i32
    %c0_i32_0 = arith.constant 0 : i32
    return %arg0, %c0_i32, %arg1 : i32, i32, i32
  }
}

</mosaic_0001>

<bundles_post_ra>
// kernel: channel_attention.2
= control target key start
LH: loop header
LB: loop body
LE: loop exit
PB: predicated region body
PF: predicated region fallthrough
CT: control target
= control target key end

     0   :  { %s761_s6 = smov 0   ;;  %s763_s7 = smov 0   ;;  %s904_s0 = inlined_call_operand.vmem [shape: f32[2,64,256], index: 0, kind: input, shape index: {}]   ;;  %s905_s1 = inlined_call_operand.vmem [shape: f32[2,64,64], index: 1, kind: output, shape index: {}]  }
   0x1   :  { %s765_s8 = smov 0   ;;  %s767_s9 = smov 0  }
   0x2   :  { %s769_s10 = smov 0   ;;  %s771_s11 = smov 0  }
   0x3   :  { %s773_s12 = smov 0  }
   0x4 LB: > { %s20_s13 = sadd.s32 1, %s740_s10  ;;  %s23_s14 = sadd.s32 1, %s744_s11  ;;  %s748_s12 = sphi %s773_s12, %s11_s12   ;;  %s744_s11 = sphi %s771_s11, %s911_s11   ;;  %s740_s10 = sphi %s769_s10, %s910_s10   ;;  %s736_s9 = sphi %s767_s9, %s909_s9   ;;  %s732_s8 = sphi %s765_s8, %s908_s8   ;;  %s728_s7 = sphi %s763_s7, %s907_s7   ;;  %s724_s6 = sphi %s761_s6, %s906_s6  }
   0x5   : > { %p21_p0 = scmp.ge.s32.totalorder %s20_s13, 2  ;;  %p39_p1 = scmp.ne.s32.totalorder %s728_s7, %s724_s6 }
   0x6   : > { %p40_p2 = scmp.eq.s32.totalorder %s748_s12, 0  ;;  %s32_s18 = sadd.s32 1, %s728_s7 }
   0x7   : > { %s913_s13 = smov (%p21_p0, %s20_s13), 0  ;;  %s915_s14 = smov (!%p21_p0, %s23_s14), %s744_s11 }
   0x8   : > { %p41_p3 = por %p40_p2, %p39_p1  ;;  %p25_p4 = scmp.ge.s32.totalorder %s915_s14, 2 }
   0x9   : > { %s28_s15 = ssub.s32 %s740_s10, %s913_s13  ;;  %p532_p6 = scmp.ge.s32.totalorder %s748_s12, 4 }
   0xa   : > { %s917_s14 = smov (%p25_p4, %s915_s14), 0 }
   0xb   : > { %s27_s16 = ssub.s32 %s744_s11, %s917_s14  ;;  %91 = sbr.rel (%p532_p6) target bundleno = 26 (0x1a), region = 16 }
   0xc   : > { %s29_s17 = sor.u32 %s28_s15, %s27_s16 }
   0xd   : > { %p30_p5 = scmp.eq.s32.totalorder %s29_s17, 0 }
   0xf   : > { %s812_s19 = scalar_select %p30_p5, %s728_s7, %s32_s18  }
  0x10   : > { %94 = sbr.rel (!%p41_p3) target bundleno = 26 (0x1a), region = 20  ;;  %s96_s20 = sand.u32 (%p41_p3), 1, %s728_s7  }
  0x11   : > { %s534_s21 = sshll.u32 (%p41_p3), %s744_s11, 4  ;;  %s533_s22 = sshll.u32 (%p41_p3), %s96_s20, 6 }
  0x12   : > { %s100_s23 = sadd.s32 (%p41_p3), %s740_s10, %s534_s21  ;;  %s98_s28 = scalar_lea.vmem (%p41_p3), [#allocation3], %s533_s22 }
  0x13   : > { %s535_s24 = sshll.u32 (%p41_p3), %s100_s23, 3 }
  0x14   : > { %s102_s27 = scalar_lea.vmem (%p41_p3), %s904_s0, %s535_s24 }
  0x15   : > { %v145_v0 = vld [vmem:[%s102_s27] sm:$0xff]  ;;  %v147_v1 = vld [vmem:[%s102_s27 + $0x10] sm:$0xff] }
  0x16   : > { %v149_v2 = vld [vmem:[%s102_s27 + $0x20] sm:$0xff]  ;;  %146 = vst [vmem:[%s98_s28] sm:$0xff] %v145_v0  ;;  %148 = vst [vmem:[%s98_s28 + $0x8] sm:$0xff] %v147_v1  ;;  %v151_v3 = vld [vmem:[%s102_s27 + $0x30] sm:$0xff] }
  0x17   : > { %150 = vst [vmem:[%s98_s28 + $0x10] sm:$0xff] %v149_v2  ;;  %v153_v4 = vld [vmem:[%s102_s27 + $0x40] sm:$0xff]  ;;  %v155_v5 = vld [vmem:[%s102_s27 + $0x50] sm:$0xff]  ;;  %152 = vst [vmem:[%s98_s28 + $0x18] sm:$0xff] %v151_v3 }
  0x18   : > { %154 = vst [vmem:[%s98_s28 + $0x20] sm:$0xff] %v153_v4  ;;  %156 = vst [vmem:[%s98_s28 + $0x28] sm:$0xff] %v155_v5  ;;  %v157_v6 = vld [vmem:[%s102_s27 + $0x60] sm:$0xff]  ;;  %v159_v7 = vld [vmem:[%s102_s27 + $0x70] sm:$0xff] }
  0x19   : > { %158 = vst [vmem:[%s98_s28 + $0x30] sm:$0xff] %v157_v6  ;;  %160 = vst [vmem:[%s98_s28 + $0x38] sm:$0xff] %v159_v7 }
  0x1a PF: > { %p536_p7 = scmp.ge.s32.totalorder %s748_s12, 1  ;;  %p165_p8 = scmp.lt.s32.totalorder %s748_s12, 5 }
  0x1c   : > { %p166_p9 = pnand %p536_p7, %p165_p8 }
  0x1d   : > { %s172_s29 = sand.u32 (!%p166_p9), 1, %s724_s6   ;;  %p191_p10 = scmp.lt.s32.totalorder (!%p166_p9), %s736_s9, 1 }
  0x1e   : > { %169 = sbr.rel (%p166_p9) target bundleno = 613 (0x265), region = 58  ;;  %s537_s30 = sshll.u32 (!%p166_p9), %s172_s29, 6 }
  0x1f   : > { %s831_s15 = scalar_lea.vmem (!%p166_p9), [#allocation3], %s537_s30  ;;  %p540_p11 = scmp.ne.s32.totalorder (!%p166_p9), %s732_s8, 0 }
  0x23   : > { %s919_s9 = smov (!%p191_p10, %s736_s9), 1  ;;  %199 = sbr.rel (%p540_p11) target bundleno = 45 (0x2d), region = 66 }
  0x24   : > { %s544_s2 = sshll.u32 %s919_s9, 6 }
  0x25   : > { %s829_s5 = scalar_lea.vmem %s905_s1, %s544_s2 }
  0x28   : > { %vm200_vm0 = vcmask 523264   ;;  %v750_v8 = vmov 0.0  }
  0x29   : > { %201 = vst.msk [vmem:[#allocation2] sm:$0xff] %vm200_vm0, %v750_v8  ;;  %202 = vst.msk [vmem:[#allocation2 + $0x8] sm:$0xff] %vm200_vm0, %v750_v8 }
  0x2a   : > { %203 = vst.msk [vmem:[#allocation2 + $0x10] sm:$0xff] %vm200_vm0, %v750_v8  ;;  %204 = vst.msk [vmem:[#allocation2 + $0x18] sm:$0xff] %vm200_vm0, %v750_v8 }
  0x2b   : > { %205 = vst.msk [vmem:[#allocation2 + $0x20] sm:$0xff] %vm200_vm0, %v750_v8  ;;  %206 = vst.msk [vmem:[#allocation2 + $0x28] sm:$0xff] %vm200_vm0, %v750_v8 }
  0x2c   : > { %207 = vst.msk [vmem:[#allocation2 + $0x30] sm:$0xff] %vm200_vm0, %v750_v8  ;;  %208 = vst.msk [vmem:[#allocation2 + $0x38] sm:$0xff] %vm200_vm0, %v750_v8 }
  0x2d PF: > { %v216_v9 = vld [vmem:[%s831_s15 + $0x38] sm:$0xff]  ;;  %v215_v10 = vld [vmem:[%s831_s15 + $0x30] sm:$0xff]  ;;  %v213_v11 = vld [vmem:[%s831_s15 + $0x20] sm:$0xff]  ;;  %vm338_vm1 = vcmask 523264   ;;  %p541_p12 = scmp.ne.s32.totalorder %s732_s8, 1 }
  0x2e   : > { %561 = vmatprep.subr.mxu0 %v216_v9  ;;  %589 = vmatprep.subr.mxu1 %v216_v9  ;;  %v209_v12 = vld [vmem:[%s831_s15] sm:$0xff]  ;;  %v214_v13 = vld [vmem:[%s831_s15 + $0x28] sm:$0xff]  ;;  %v212_v14 = vld [vmem:[%s831_s15 + $0x18] sm:$0xff] }
  0x2f   : > { %562 = vmatpush3.xpose.msra.mxu0 %v216_v9  ;;  %597 = vmatpush3.xpose.msra.mxu1 %v216_v9  ;;  %v211_v15 = vld [vmem:[%s831_s15 + $0x10] sm:$0xff]  ;;  %v210_v16 = vld [vmem:[%s831_s15 + $0x8] sm:$0xff] }
  0x30   : > { %563 = vmatprep.subr.mxu0 %v215_v10  ;;  %590 = vmatprep.subr.mxu1 %v215_v10  ;;  %v218_v17 = vld [vmem:[#allocation2 + $0x8] sm:$0xff]  ;;  %v217_v21 = vld [vmem:[#allocation2] sm:$0xff] }
  0x31   : > { %577 = vmatprep.mubr.f32.mxu0 %v209_v12  ;;  %583 = vmatprep.mubr.f32.mxu1 %v213_v11  ;;  %v220_v27 = vld [vmem:[#allocation2 + $0x18] sm:$0xff]  ;;  %v219_v33 = vld [vmem:[#allocation2 + $0x10] sm:$0xff] }
  0x32   : > { %v222_v18 = vld [vmem:[#allocation2 + $0x28] sm:$0xff]  ;;  %v221_v22 = vld [vmem:[#allocation2 + $0x20] sm:$0xff] }
  0x33   : > { %564 = vmatpush3.xpose.msra.mxu0 %v215_v10  ;;  %598 = vmatpush3.xpose.msra.mxu1 %v215_v10  ;;  %v224_v28 = vld [vmem:[#allocation2 + $0x38] sm:$0xff]  ;;  %v223_v34 = vld [vmem:[#allocation2 + $0x30] sm:$0xff] }
  0x34   : > { %565 = vmatprep.subr.mxu0 %v214_v13  ;;  %591 = vmatprep.subr.mxu1 %v214_v13 }
  0x37   : > { %566 = vmatpush3.xpose.msra.mxu0 %v214_v13  ;;  %599 = vmatpush3.xpose.msra.mxu1 %v214_v13 }
  0x38   : > { %567 = vmatprep.subr.mxu0 %v213_v11  ;;  %592 = vmatprep.subr.mxu1 %v213_v11 }
  0x3b   : > { %568 = vmatpush3.xpose.msra.mxu0 %v213_v11  ;;  %600 = vmatpush3.xpose.msra.mxu1 %v213_v11 }
  0x3c   : > { %569 = vmatprep.subr.mxu0 %v212_v14  ;;  %593 = vmatprep.subr.mxu1 %v212_v14 }
  0x3f   : > { %570 = vmatpush3.xpose.msra.mxu0 %v212_v14  ;;  %601 = vmatpush3.xpose.msra.mxu1 %v212_v14 }
  0x40   : > { %571 = vmatprep.subr.mxu0 %v211_v15  ;;  %594 = vmatprep.subr.mxu1 %v211_v15 }
  0x43   : > { %572 = vmatpush3.xpose.msra.mxu0 %v211_v15  ;;  %602 = vmatpush3.xpose.msra.mxu1 %v211_v15 }
  0x44   : > { %573 = vmatprep.subr.mxu0 %v210_v16  ;;  %595 = vmatprep.subr.mxu1 %v210_v16 }
  0x47   : > { %574 = vmatpush3.xpose.msra.mxu0 %v210_v16  ;;  %603 = vmatpush3.xpose.msra.mxu1 %v210_v16 }
  0x48   : > { %575 = vmatprep.subr.mxu0 %v209_v12  ;;  %596 = vmatprep.subr.mxu1 %v209_v12 }
  0x4b   : > { %576 = vmatpush3.xpose.msra.mxu0 %v209_v12  ;;  %604 = vmatpush3.xpose.msra.mxu1 %v209_v12 }
  0x4e   : > { %578 = vmatmul.mubr.f32.vlgmr.msra.gmra.mxu0 %v210_v16  ;;  %584 = vmatmul.mubr.f32.vlgmr.msra.gmra.mxu1 %v214_v13 }
  0x4f   : > { %580 = vmatprep.mubr.f32.mxu0 %v211_v15  ;;  %586 = vmatprep.mubr.f32.mxu1 %v215_v10 }
  0x52   : > { %581 = vmatmul.mubr.f32.gmra.mxu0 %v212_v14  ;;  %587 = vmatmul.mubr.f32.gmra.mxu1 %v216_v9 }
 0x10e   : > { %v579_v19 = vpop.f32.mrf.mxu0  ;;  %v585_v20 = vpop.f32.mrf.mxu1 }
 0x10f   : > { %v331_v23 = vadd.f32 %v579_v19, %v218_v17  ;;  %v335_v24 = vadd.f32 %v585_v20, %v222_v18 }
 0x110   : > { %v291_v25 = vpop.f32.mrf.mxu0  ;;  %v311_v26 = vpop.f32.mrf.mxu1 }
 0x111   : > { %340 = vst.msk [vmem:[#allocation2 + $0x8] sm:$0xff] %vm338_vm1, %v331_v23  ;;  %344 = vst.msk [vmem:[#allocation2 + $0x28] sm:$0xff] %vm338_vm1, %v335_v24  ;;  %v330_v29 = vadd.f32 %v291_v25, %v217_v21  ;;  %v334_v30 = vadd.f32 %v311_v26, %v221_v22 }
 0x112   : > { %v582_v31 = vpop.f32.mrf.mxu0  ;;  %v588_v32 = vpop.f32.mrf.mxu1 }
 0x113   : > { %339 = vst.msk [vmem:[#allocation2] sm:$0xff] %vm338_vm1, %v330_v29  ;;  %343 = vst.msk [vmem:[#allocation2 + $0x20] sm:$0xff] %vm338_vm1, %v334_v30  ;;  %v333_v35 = vadd.f32 %v582_v31, %v220_v27  ;;  %v337_v36 = vadd.f32 %v588_v32, %v224_v28  ;;  %350 = sbr.rel (%p541_p12) target bundleno = 613 (0x265), region = 70 }
 0x114   : > { %v301_v37 = vpop.f32.mrf.mxu0  ;;  %v321_v38 = vpop.f32.mrf.mxu1 }
 0x115   : > { %342 = vst.msk [vmem:[#allocation2 + $0x18] sm:$0xff] %vm338_vm1, %v333_v35  ;;  %346 = vst.msk [vmem:[#allocation2 + $0x38] sm:$0xff] %vm338_vm1, %v337_v36  ;;  %v332_v39 = vadd.f32 %v301_v37, %v219_v33  ;;  %v336_v40 = vadd.f32 %v321_v38, %v223_v34 }
 0x117   : > { %341 = vst.msk [vmem:[#allocation2 + $0x10] sm:$0xff] %vm338_vm1, %v332_v39  ;;  %345 = vst.msk [vmem:[#allocation2 + $0x30] sm:$0xff] %vm338_vm1, %v336_v40 }
 0x118   : > { %v352_v43 = vld [vmem:[#allocation2 + $0x8] sm:$0xff] }
 0x119   : > { %v362_v47 = vsel %vm338_vm1, %v352_v43, inf  ;;  %v356_v50 = vld [vmem:[#allocation2 + $0x28] sm:$0xff] }
 0x11a   : > { %v351_v41 = vld [vmem:[#allocation2] sm:$0xff]  ;;  %v374_v52 = vsel %vm338_vm1, %v356_v50, inf }
 0x11b   : > { %v359_v44 = vsel %vm338_vm1, %v351_v41, inf  ;;  %v355_v49 = vld [vmem:[#allocation2 + $0x20] sm:$0xff] }
 0x11c   : > { %v354_v46 = vld [vmem:[#allocation2 + $0x18] sm:$0xff]  ;;  %360 = vmin.xlane.f32.xlu0 %v359_v44  ;;  %v371_v51 = vsel %vm338_vm1, %v355_v49, inf }
 0x11d   : > { %v368_v48 = vsel %vm338_vm1, %v354_v46, inf  ;;  %v358_v54 = vld [vmem:[#allocation2 + $0x38] sm:$0xff] }
 0x11e   : > { %v353_v42 = vld [vmem:[#allocation2 + $0x10] sm:$0xff]  ;;  %v380_v56 = vsel %vm338_vm1, %v358_v54, inf }
 0x11f   : > { %v365_v45 = vsel %vm338_vm1, %v353_v42, inf  ;;  %v357_v53 = vld [vmem:[#allocation2 + $0x30] sm:$0xff] }
 0x120   : > { %366 = vmin.xlane.f32.xlu1 %v365_v45  ;;  %363 = vmin.xlane.f32.xlu0 %v362_v47  ;;  %v377_v55 = vsel %vm338_vm1, %v357_v53, inf }
 0x124   : > { %369 = vmin.xlane.f32.xlu1 %v368_v48  ;;  %372 = vmin.xlane.f32.xlu0 %v371_v51 }
 0x128   : > { %375 = vmin.xlane.f32.xlu1 %v374_v52  ;;  %378 = vmin.xlane.f32.xlu0 %v377_v55 }
 0x12c   : > { %381 = vmin.xlane.f32.xlu1 %v380_v56 }
 0x1a5   : > { %v361_v57 = vpop.xlane.xlu0 %360 }
 0x1a6   : > { %v383_v59 = vsub.f32 %v361_v57, %v351_v41 }
 0x1a8   : > { %v391_v61 = vmul.f32 1.442695, %v383_v59 }
 0x1a9   : > { %v367_v58 = vpop.xlane.xlu1 %366  ;;  %v364_v63 = vpop.xlane.xlu0 %363 }
 0x1aa   : > { %v385_v60 = vsub.f32 %v367_v58, %v353_v42  ;;  %662 = vpow2.f32 %v391_v61  ;;  %v384_v1 = vsub.f32 %v364_v63, %v352_v43 }
 0x1ac   : > { %v395_v62 = vmul.f32 1.442695, %v385_v60  ;;  %v393_v3 = vmul.f32 1.442695, %v384_v1 }
 0x1ad   : > { %v370_v0 = vpop.xlane.xlu1 %369  ;;  %v373_v5 = vpop.xlane.xlu0 %372 }
 0x1ae   : > { %v386_v2 = vsub.f32 %v370_v0, %v354_v46  ;;  %664 = vpow2.f32 %v395_v62  ;;  %v387_v7 = vsub.f32 %v373_v5, %v355_v49 }
 0x1af   : > { %666 = vpow2.f32 %v393_v3 }
 0x1b0   : > { %v397_v4 = vmul.f32 1.442695, %v386_v2  ;;  %v399_v9 = vmul.f32 1.442695, %v387_v7 }
 0x1b1   : > { %v376_v6 = vpop.xlane.xlu1 %375  ;;  %v379_v11 = vpop.xlane.xlu0 %378 }
 0x1b2   : > { %v388_v8 = vsub.f32 %v376_v6, %v356_v50  ;;  %668 = vpow2.f32 %v397_v4  ;;  %v389_v13 = vsub.f32 %v379_v11, %v357_v53 }
 0x1b3   : > { %670 = vpow2.f32 %v399_v9 }
 0x1b4   : > { %v401_v10 = vmul.f32 1.442695, %v388_v8  ;;  %v403_v15 = vmul.f32 1.442695, %v389_v13 }
 0x1b5   : > { %v382_v12 = vpop.xlane.xlu1 %381 }
 0x1b6   : > { %v390_v14 = vsub.f32 %v382_v12, %v358_v54  ;;  %672 = vpow2.f32 %v401_v10 }
 0x1b7   : > { %674 = vpow2.f32 %v403_v15  ;;  %v663_v17 = vpop.eup %662 }
 0x1b8   : > { %v405_v16 = vmul.f32 1.442695, %v390_v14  ;;  %v407_v19 = vsel %vm338_vm1, %v663_v17, 0.0 }
 0x1b9   : > { %408 = vadd.xlane.f32.xlu0 %v407_v19 }
 0x1ba   : > { %676 = vpow2.f32 %v405_v16 }
 0x1bb   : > { %v665_v18 = vpop.eup %664 }
 0x1bc   : > { %v413_v20 = vsel %vm338_vm1, %v665_v18, 0.0  ;;  %v667_v21 = vpop.eup %666 }
 0x1bd   : > { %v410_v23 = vsel %vm338_vm1, %v667_v21, 0.0  ;;  %414 = vadd.xlane.f32.xlu0 %v413_v20 }
 0x1be   : > { %411 = vadd.xlane.f32.xlu1 %v410_v23 }
 0x1bf   : > { %v669_v22 = vpop.eup %668 }
 0x1c0   : > { %v416_v24 = vsel %vm338_vm1, %v669_v22, 0.0  ;;  %v671_v25 = vpop.eup %670 }
 0x1c1   : > { %v419_v27 = vsel %vm338_vm1, %v671_v25, 0.0 }
 0x1c2   : > { %417 = vadd.xlane.f32.xlu1 %v416_v24  ;;  %420 = vadd.xlane.f32.xlu0 %v419_v27 }
 0x1c3   : > { %v673_v26 = vpop.eup %672 }
 0x1c4   : > { %v422_v28 = vsel %vm338_vm1, %v673_v26, 0.0  ;;  %v675_v29 = vpop.eup %674 }
 0x1c5   : > { %v425_v31 = vsel %vm338_vm1, %v675_v29, 0.0 }
 0x1c6   : > { %423 = vadd.xlane.f32.xlu1 %v422_v28  ;;  %426 = vadd.xlane.f32.xlu0 %v425_v31 }
 0x1c7   : > { %v677_v30 = vpop.eup %676 }
 0x1c8   : > { %v428_v32 = vsel %vm338_vm1, %v677_v30, 0.0 }
 0x1ca   : > { %429 = vadd.xlane.f32.xlu1 %v428_v32 }
 0x242   : > { %v409_v33 = vpop.xlane.xlu0 %408 }
 0x243   : > { %678 = vrcp.f32 %v409_v33 }
 0x246   : > { %v415_v35 = vpop.xlane.xlu0 %414 }
 0x247   : > { %v412_v34 = vpop.xlane.xlu1 %411 }
 0x248   : > { %680 = vrcp.f32 %v412_v34 }
 0x249   : > { %682 = vrcp.f32 %v415_v35 }
 0x24b   : > { %v418_v36 = vpop.xlane.xlu1 %417  ;;  %v421_v37 = vpop.xlane.xlu0 %420 }
 0x24c   : > { %684 = vrcp.f32 %v418_v36 }
 0x24d   : > { %686 = vrcp.f32 %v421_v37 }
 0x24f   : > { %v424_v38 = vpop.xlane.xlu1 %423  ;;  %v427_v39 = vpop.xlane.xlu0 %426 }
 0x250   : > { %688 = vrcp.f32 %v424_v38  ;;  %v679_v40 = vpop.eup %678 }
 0x251   : > { %690 = vrcp.f32 %v427_v39  ;;  %v432_v41 = vmul.f32 %v679_v40, %v663_v17 }
 0x253   : > { %v430_v42 = vpop.xlane.xlu1 %429  ;;  %447 = vst.msk [vmem:[%s829_s5] sm:$0xff] %vm338_vm1, %v432_v41 }
 0x254   : > { %692 = vrcp.f32 %v430_v42 }
 0x255   : > { %v681_v43 = vpop.eup %680 }
 0x256   : > { %v683_v44 = vpop.eup %682  ;;  %v434_v45 = vmul.f32 %v681_v43, %v667_v21 }
 0x257   : > { %v436_v46 = vmul.f32 %v683_v44, %v665_v18 }
 0x258   : > { %448 = vst.msk [vmem:[%s829_s5 + $0x8] sm:$0xff] %vm338_vm1, %v434_v45 }
 0x259   : > { %v685_v47 = vpop.eup %684  ;;  %449 = vst.msk [vmem:[%s829_s5 + $0x10] sm:$0xff] %vm338_vm1, %v436_v46 }
 0x25a   : > { %v687_v48 = vpop.eup %686  ;;  %v438_v49 = vmul.f32 %v685_v47, %v669_v22 }
 0x25b   : > { %v440_v50 = vmul.f32 %v687_v48, %v671_v25 }
 0x25c   : > { %450 = vst.msk [vmem:[%s829_s5 + $0x18] sm:$0xff] %vm338_vm1, %v438_v49 }
 0x25d   : > { %v689_v51 = vpop.eup %688  ;;  %451 = vst.msk [vmem:[%s829_s5 + $0x20] sm:$0xff] %vm338_vm1, %v440_v50 }
 0x25e   : > { %v691_v52 = vpop.eup %690  ;;  %v442_v53 = vmul.f32 %v689_v51, %v673_v26 }
 0x25f   : > { %v444_v54 = vmul.f32 %v691_v52, %v675_v29 }
 0x260   : > { %452 = vst.msk [vmem:[%s829_s5 + $0x28] sm:$0xff] %vm338_vm1, %v442_v53 }
 0x261   : > { %v693_v55 = vpop.eup %692  ;;  %453 = vst.msk [vmem:[%s829_s5 + $0x30] sm:$0xff] %vm338_vm1, %v444_v54 }
 0x262   : > { %v446_v56 = vmul.f32 %v693_v55, %v677_v30 }
 0x264   : > { %454 = vst.msk [vmem:[%s829_s5 + $0x38] sm:$0xff] %vm338_vm1, %v446_v56 }
 0x265 PF: > { %s11_s12 = sadd.s32 1, %s748_s12   ;;  %s906_s6 = smov %s728_s7 }
 0x266   : > { %p8_p13 = scmp.ge.s32.totalorder %s11_s12, 6   ;;  %s907_s7 = smov %s812_s19 }
 0x267   : > { %s908_s8 = smov %s740_s10  ;;  %s909_s9 = smov %s744_s11 }
 0x268   : > { %s910_s10 = smov %s913_s13  ;;  %s911_s11 = smov %s917_s14 }
 0x269   :  { %10 = sbr.rel (!%p8_p13) target bundleno = 4 (0x4), region = 105 }

// kernel: channel_attention.3
= control target key start
LH: loop header
LB: loop body
LE: loop exit
PB: predicated region body
PF: predicated region fallthrough
CT: control target
= control target key end

     0   :  { %s999_s0 = inlined_call_operand.<no memory space> [shape: f32[1], index: 0, kind: input, shape index: {}]   ;;  %s1000_s1 = inlined_call_operand.vmem [shape: f32[2,64,64], index: 1, kind: input, shape index: {}]   ;;  %s1001_s2 = inlined_call_operand.vmem [shape: f32[2,64,256], index: 2, kind: input, shape index: {}]   ;;  %s1002_s3 = inlined_call_operand.vmem [shape: f32[2,64,256], index: 3, kind: output, shape index: {}]  }
   0x1   :  { %8 = sst [smem:[#allocation2]] %s999_s0 }
   0x2   :  { %s816_s14 = smov 0   ;;  %s818_s15 = smov 0  }
   0x3   :  { %s820_s16 = smov 0   ;;  %s822_s17 = smov 0  }
   0x4   :  { %s824_s18 = smov 0   ;;  %s826_s19 = smov 0  }
   0x5   :  { %s828_s20 = smov 0  }
   0x6 LB: > { %s23_s0 = sadd.s32 1, %s783_s18  ;;  %s26_s21 = sadd.s32 1, %s787_s19  ;;  %s791_s20 = sphi %s828_s20, %s14_s20   ;;  %s787_s19 = sphi %s826_s19, %s1009_s19   ;;  %s783_s18 = sphi %s824_s18, %s1008_s18   ;;  %s779_s17 = sphi %s822_s17, %s1007_s17   ;;  %s775_s16 = sphi %s820_s16, %s1006_s16   ;;  %s771_s15 = sphi %s818_s15, %s1005_s15   ;;  %s767_s14 = sphi %s816_s14, %s1004_s14  }
   0x7   : > { %p24_p0 = scmp.ge.s32.totalorder %s23_s0, 2  ;;  %s595_s22 = sadd.s32 4294967295, %s791_s20  }
   0x8   : > { %p89_p1 = scmp.ne.s32.totalorder %s771_s15, %s767_s14  ;;  %p90_p2 = scmp.eq.s32.totalorder %s791_s20, 0 }
   0x9   : > { %s1011_s0 = smov (%p24_p0, %s23_s0), 0  ;;  %s1013_s21 = smov (!%p24_p0, %s26_s21), %s787_s19 }
   0xa   : > { %p28_p3 = scmp.ge.s32.totalorder %s1013_s21, 2  ;;  %p121_p4 = scmp.eq.s32.totalorder %s595_s22, 3 }
   0xb   : > { %s78_s23 = ssub.s32 %s783_s18, %s1011_s0  ;;  %p91_p5 = por %p90_p2, %p89_p1 }
   0xc   : > { %s1015_s21 = smov (%p28_p3, %s1013_s21), 0  ;;  %p864_p6 = por %p121_p4, %p89_p1 }
   0xd   : > { %s77_s25 = ssub.s32 %s787_s19, %s1015_s21  ;;  %s82_s27 = sadd.s32 1, %s771_s15 }
   0xe   : > { %s79_s26 = sor.u32 %s78_s23, %s77_s25  ;;  %p598_p8 = scmp.ge.s32.totalorder %s791_s20, 4 }
   0xf   : > { %p80_p7 = scmp.eq.s32.totalorder %s79_s26, 0 }
  0x10   : > { %146 = sbr.rel (%p598_p8) target bundleno = 31 (0x1f), region = 20 }
  0x11   : > { %s872_s28 = scalar_select %p80_p7, %s771_s15, %s82_s27  }
  0x15   : > { %157 = sbr.rel (!%p91_p5) target bundleno = 31 (0x1f), region = 28  ;;  %s159_s29 = sand.u32 (%p91_p5), 1, %s771_s15  }
  0x16   : > { %s600_s30 = sshll.u32 (%p91_p5), %s787_s19, 4  ;;  %s599_s4 = sshll.u32 (%p91_p5), %s159_s29, 6 }
  0x17   : > { %s163_s5 = sadd.s32 (%p91_p5), %s783_s18, %s600_s30  ;;  %s161_s10 = scalar_lea.vmem (%p91_p5), [#allocation3], %s599_s4 }
  0x18   : > { %s601_s6 = sshll.u32 (%p91_p5), %s163_s5, 3 }
  0x19   : > { %s165_s9 = scalar_lea.vmem (%p91_p5), %s1001_s2, %s601_s6 }
  0x1a   : > { %v208_v0 = vld [vmem:[%s165_s9] sm:$0xff]  ;;  %v210_v1 = vld [vmem:[%s165_s9 + $0x10] sm:$0xff] }
  0x1b   : > { %v212_v2 = vld [vmem:[%s165_s9 + $0x20] sm:$0xff]  ;;  %209 = vst [vmem:[%s161_s10] sm:$0xff] %v208_v0  ;;  %211 = vst [vmem:[%s161_s10 + $0x8] sm:$0xff] %v210_v1  ;;  %v214_v3 = vld [vmem:[%s165_s9 + $0x30] sm:$0xff] }
  0x1c   : > { %213 = vst [vmem:[%s161_s10 + $0x10] sm:$0xff] %v212_v2  ;;  %v216_v4 = vld [vmem:[%s165_s9 + $0x40] sm:$0xff]  ;;  %v218_v5 = vld [vmem:[%s165_s9 + $0x50] sm:$0xff]  ;;  %215 = vst [vmem:[%s161_s10 + $0x18] sm:$0xff] %v214_v3 }
  0x1d   : > { %217 = vst [vmem:[%s161_s10 + $0x20] sm:$0xff] %v216_v4  ;;  %219 = vst [vmem:[%s161_s10 + $0x28] sm:$0xff] %v218_v5  ;;  %v220_v6 = vld [vmem:[%s165_s9 + $0x60] sm:$0xff]  ;;  %v222_v7 = vld [vmem:[%s165_s9 + $0x70] sm:$0xff] }
  0x1e   : > { %221 = vst [vmem:[%s161_s10 + $0x30] sm:$0xff] %v220_v6  ;;  %223 = vst [vmem:[%s161_s10 + $0x38] sm:$0xff] %v222_v7 }
  0x1f PF: > { %p602_p9 = scmp.ge.s32.totalorder %s791_s20, 1  ;;  %p228_p10 = scmp.lt.s32.totalorder %s791_s20, 5 }
  0x21   : > { %p229_p11 = pnand %p602_p9, %p228_p10 }
  0x22   : > { %s235_s11 = sand.u32 (!%p229_p11), 1, %s767_s14   ;;  %p262_p12 = scmp.lt.s32.totalorder (!%p229_p11), %s779_s17, 1 }
  0x23   : > { %232 = sbr.rel (%p229_p11) target bundleno = 271 (0x10f), region = 66  ;;  %s884_s12 = sshll.u32 (!%p229_p11), %s235_s11, 6 }
  0x24   : > { %s887_s13 = scalar_lea.vmem (!%p229_p11), [#allocation3], %s884_s12  ;;  %s413_s27 = sld [smem:[#allocation2]] (!%p229_p11) }
  0x25   : > { %s948_s29 = scalar_lea.vmem (!%p229_p11), [#allocation4], %s884_s12 }
  0x28   : > { %v890_v8 = vld [vmem:[%s887_s13 + $0x38] sm:$0xff]  ;;  %v893_v9 = vld [vmem:[%s887_s13 + $0x30] sm:$0xff]  ;;  %v901_v10 = vld [vmem:[%s887_s13 + $0x28] sm:$0xff]  ;;  %s263_s14 = scalar_select %p262_p12, %s779_s17, 1  ;;  %vm283_vm0 = vcmask 523264  }
  0x29   : > { %637 = vmatprep.subr.mxu0 %v890_v8  ;;  %665 = vmatprep.subr.mxu1 %v890_v8  ;;  %v908_v11 = vld [vmem:[%s887_s13 + $0x20] sm:$0xff]  ;;  %v916_v12 = vld [vmem:[%s887_s13 + $0x18] sm:$0xff]  ;;  %v923_v13 = vld [vmem:[%s887_s13 + $0x10] sm:$0xff]  ;;  %s616_s30 = sshll.u32 (%p864_p6), %s779_s17, 4 }
  0x2a   : > { %638 = vmatpush3.msra.mxu0 %v890_v8  ;;  %673 = vmatpush3.msra.mxu1 %v890_v8  ;;  %s620_s22 = sshll.u32 %s263_s14, 6  ;;  %v268_v14 = vld [vmem:[%s887_s13 + $0x8] sm:$0xff]  ;;  %v267_v15 = vld [vmem:[%s887_s13] sm:$0xff]  ;;  %v414_v24 = vstv %s413_s27  ;;  %s447_s4 = sadd.s32 (%p864_p6), %s775_s16, %s616_s30 }
  0x2b   : > { %639 = vmatprep.subr.mxu0 %v893_v9  ;;  %666 = vmatprep.subr.mxu1 %v893_v9  ;;  %s266_s26 = scalar_lea.vmem %s1000_s1, %s620_s22  ;;  %s617_s24 = sshll.u32 (%p864_p6), %s447_s4, 3 }
  0x2c   : > { %640 = vmatpush3.msra.mxu0 %v893_v9  ;;  %674 = vmatpush3.msra.mxu1 %v893_v9  ;;  %v275_v16 = vld [vmem:[%s266_s26] sm:$0xff]  ;;  %v276_v18 = vld [vmem:[%s266_s26 + $0x8] sm:$0xff]  ;;  %v277_v20 = vld [vmem:[%s266_s26 + $0x10] sm:$0xff]  ;;  %s449_s7 = scalar_lea.vmem (%p864_p6), %s1002_s3, %s617_s24 }
  0x2d   : > { %641 = vmatprep.subr.mxu0 %v901_v10  ;;  %667 = vmatprep.subr.mxu1 %v901_v10  ;;  %v279_v17 = vld [vmem:[%s266_s26 + $0x20] sm:$0xff]  ;;  %v280_v19 = vld [vmem:[%s266_s26 + $0x28] sm:$0xff]  ;;  %v281_v21 = vld [vmem:[%s266_s26 + $0x30] sm:$0xff] }
  0x2e   : > { %642 = vmatpush3.msra.mxu0 %v901_v10  ;;  %675 = vmatpush3.msra.mxu1 %v901_v10  ;;  %v278_v22 = vld [vmem:[%s266_s26 + $0x18] sm:$0xff] }
  0x2f   : > { %643 = vmatprep.subr.mxu0 %v908_v11  ;;  %668 = vmatprep.subr.mxu1 %v908_v11  ;;  %v282_v23 = vld [vmem:[%s266_s26 + $0x38] sm:$0xff] }
  0x30   : > { %644 = vmatpush3.msra.mxu0 %v908_v11  ;;  %676 = vmatpush3.msra.mxu1 %v908_v11 }
  0x31   : > { %645 = vmatprep.subr.mxu0 %v916_v12  ;;  %669 = vmatprep.subr.mxu1 %v916_v12 }
  0x32   : > { %646 = vmatpush3.msra.mxu0 %v916_v12  ;;  %677 = vmatpush3.msra.mxu1 %v916_v12 }
  0x33   : > { %647 = vmatprep.subr.mxu0 %v923_v13  ;;  %670 = vmatprep.subr.mxu1 %v923_v13 }
  0x34   : > { %648 = vmatpush3.msra.mxu0 %v923_v13  ;;  %678 = vmatpush3.msra.mxu1 %v923_v13 }
  0x35   : > { %649 = vmatprep.subr.mxu0 %v268_v14  ;;  %671 = vmatprep.subr.mxu1 %v268_v14 }
  0x36   : > { %650 = vmatpush3.msra.mxu0 %v268_v14  ;;  %679 = vmatpush3.msra.mxu1 %v268_v14 }
  0x37   : > { %651 = vmatprep.subr.mxu0 %v267_v15  ;;  %672 = vmatprep.subr.mxu1 %v267_v15 }
  0x38   : > { %652 = vmatpush3.msra.mxu0 %v267_v15  ;;  %680 = vmatpush3.msra.mxu1 %v267_v15 }
  0x39   : > { %653 = vmatprep.mubr.msk.f32.mxu0 %vm283_vm0, %v275_v16  ;;  %659 = vmatprep.mubr.msk.f32.mxu1 %vm283_vm0, %v279_v17 }
  0x3a   : > { %654 = vmatmul.mubr.msk.f32.vlgmr.msra.gmra.mxu0 %vm283_vm0, %v276_v18  ;;  %660 = vmatmul.mubr.msk.f32.vlgmr.msra.gmra.mxu1 %vm283_vm0, %v280_v19 }
  0x3b   : > { %656 = vmatprep.mubr.msk.f32.mxu0 %vm283_vm0, %v277_v20  ;;  %662 = vmatprep.mubr.msk.f32.mxu1 %vm283_vm0, %v281_v21 }
  0x3e   : > { %657 = vmatmul.mubr.msk.f32.gmra.mxu0 %vm283_vm0, %v278_v22  ;;  %663 = vmatmul.mubr.msk.f32.gmra.mxu1 %vm283_vm0, %v282_v23 }
  0xfa   : > { %v655_v25 = vpop.f32.mrf.mxu0  ;;  %v661_v26 = vpop.f32.mrf.mxu1 }
  0xfb   : > { %v416_v27 = vmul.f32 %v655_v25, %v414_v24  ;;  %v420_v28 = vmul.f32 %v661_v26, %v414_v24 }
  0xfc   : > { %v374_v29 = vpop.f32.mrf.mxu0  ;;  %v394_v30 = vpop.f32.mrf.mxu1 }
  0xfd   : > { %v424_v31 = vadd.f32 %v416_v27, %v268_v14  ;;  %v428_v32 = vadd.f32 %v420_v28, %v901_v10  ;;  %v415_v33 = vmul.f32 %v414_v24, %v374_v29  ;;  %v419_v34 = vmul.f32 %v414_v24, %v394_v30 }
  0xfe   : > { %v658_v35 = vpop.f32.mrf.mxu0  ;;  %v664_v36 = vpop.f32.mrf.mxu1 }
  0xff   : > { %432 = vst [vmem:[%s948_s29 + $0x8] sm:$0xff] %v424_v31  ;;  %436 = vst [vmem:[%s948_s29 + $0x28] sm:$0xff] %v428_v32  ;;  %v423_v37 = vadd.f32 %v415_v33, %v267_v15  ;;  %v427_v38 = vadd.f32 %v419_v34, %v908_v11  ;;  %v418_v39 = vmul.f32 %v658_v35, %v414_v24 }
 0x100   : > { %v422_v40 = vmul.f32 %v664_v36, %v414_v24  ;;  %v384_v41 = vpop.f32.mrf.mxu0  ;;  %v404_v42 = vpop.f32.mrf.mxu1 }
 0x101   : > { %431 = vst [vmem:[%s948_s29] sm:$0xff] %v423_v37  ;;  %435 = vst [vmem:[%s948_s29 + $0x20] sm:$0xff] %v427_v38  ;;  %v426_v43 = vadd.f32 %v418_v39, %v916_v12  ;;  %v417_v45 = vmul.f32 %v414_v24, %v384_v41  ;;  %v421_v46 = vmul.f32 %v414_v24, %v404_v42  ;;  %445 = sbr.rel (!%p864_p6) target bundleno = 271 (0x10f), region = 74 }
 0x102   : > { %v430_v44 = vadd.f32 %v422_v40, %v890_v8 }
 0x103   : > { %434 = vst [vmem:[%s948_s29 + $0x18] sm:$0xff] %v426_v43  ;;  %v425_v47 = vadd.f32 %v417_v45, %v923_v13  ;;  %v429_v48 = vadd.f32 %v421_v46, %v893_v9 }
 0x104   : > { %438 = vst [vmem:[%s948_s29 + $0x38] sm:$0xff] %v430_v44 }
 0x105   : > { %433 = vst [vmem:[%s948_s29 + $0x10] sm:$0xff] %v425_v47  ;;  %437 = vst [vmem:[%s948_s29 + $0x30] sm:$0xff] %v429_v48 }
 0x106   : > { %v494_v50 = vld [vmem:[%s948_s29 + $0x8] sm:$0xff] }
 0x107   : > { %v502_v54 = vld [vmem:[%s948_s29 + $0x28] sm:$0xff]  ;;  %495 = vst [vmem:[%s449_s7 + $0x10] sm:$0xff] %v494_v50 }
 0x108   : > { %v492_v49 = vld [vmem:[%s948_s29] sm:$0xff]  ;;  %503 = vst [vmem:[%s449_s7 + $0x50] sm:$0xff] %v502_v54 }
 0x109   : > { %v500_v53 = vld [vmem:[%s948_s29 + $0x20] sm:$0xff]  ;;  %493 = vst [vmem:[%s449_s7] sm:$0xff] %v492_v49 }
 0x10a   : > { %v498_v52 = vld [vmem:[%s948_s29 + $0x18] sm:$0xff]  ;;  %501 = vst [vmem:[%s449_s7 + $0x40] sm:$0xff] %v500_v53 }
 0x10b   : > { %v506_v56 = vld [vmem:[%s948_s29 + $0x38] sm:$0xff]  ;;  %499 = vst [vmem:[%s449_s7 + $0x30] sm:$0xff] %v498_v52 }
 0x10c   : > { %v496_v51 = vld [vmem:[%s948_s29 + $0x10] sm:$0xff]  ;;  %507 = vst [vmem:[%s449_s7 + $0x70] sm:$0xff] %v506_v56 }
 0x10d   : > { %v504_v55 = vld [vmem:[%s948_s29 + $0x30] sm:$0xff]  ;;  %497 = vst [vmem:[%s449_s7 + $0x20] sm:$0xff] %v496_v51 }
 0x10e   : > { %505 = vst [vmem:[%s449_s7 + $0x60] sm:$0xff] %v504_v55 }
 0x10f PF: > { %s14_s20 = sadd.s32 1, %s791_s20   ;;  %s1004_s14 = smov %s771_s15 }
 0x110   : > { %p11_p13 = scmp.ge.s32.totalorder %s14_s20, 6   ;;  %s1005_s15 = smov %s872_s28 }
 0x111   : > { %s1006_s16 = smov %s783_s18  ;;  %s1007_s17 = smov %s787_s19 }
 0x112   : > { %s1008_s18 = smov %s1011_s0  ;;  %s1009_s19 = smov %s1015_s21 }
 0x113   :  { %13 = sbr.rel (!%p11_p13) target bundleno = 6 (0x6), region = 146 }

</bundles_post_ra>
